<compile_context>
chip_gen: v7x
topology: tpu7x:2x2x1
jax: 0.10.0
libtpu: 0.0.40
codegen_flags: <defaults>
</compile_context>

<pallas_src>
import jax
import jax.numpy as jnp
from jax.experimental import pallas as pl
from jax.experimental.pallas import tpu as pltpu

# ---- sizes (small, consistent with the module's structure) ---------------
B = 2            # batch (number of sentences)
T_MAX = 8        # maxlen (padded sentence length, no bos/eos in Flair)
BT = B * T_MAX   # 16: exactly one packed bf16 (16,128) sublane tile
V = 128          # synthetic vocab (clean VMEM block for in-kernel gather)
HC = 128         # char-LM stand-in feature width
HF = 128         # forward LM output width
HB = 128         # backward LM output width
HG = 128         # glove width
H2 = HF + HB     # fused fw|bw projection width = 256
EMB = HF + HB + HG   # StackedEmbeddings embedding_length = 384


# --------------------------------------------------------------------------
# Fused kernel (single invocation, whole batch):
#   gather char / glove rows for all B*T tokens (token ids in SMEM)
#   proj = tanh( char_bf16 @ W_fwbw + b_fwbw )        (one 16x128x256 matmul)
#   out  = mask * [proj | glove]                      (pad rows zeroed)
# TODO(synk): real FlairEmbeddings run pretrained recurrent character-level
#             LSTM LMs (forward + reversed); a dense+tanh projection stands in.
# --------------------------------------------------------------------------
def flair_fused_kernel(lens_ref, ids_ref, char_tbl_ref, glove_tbl_ref,
                       w_ref, b_ref, out_ref, char_sc, glove_sc):
    # ---- in-kernel embedding-table gather (ids live in SMEM) -------------
    for i in range(BT):                               # static unroll, 16 rows
        tid = ids_ref[i]
        char_sc[pl.ds(i, 1), :] = char_tbl_ref[pl.ds(tid, 1), :]
        glove_sc[pl.ds(i, 1), :] = glove_tbl_ref[pl.ds(tid, 1), :]

    # ---- one fused fw|bw projection on the MXU ----------------------------
    x = char_sc[...].astype(jnp.bfloat16)             # (16,128) full bf16 tile
    proj = jnp.tanh(
        jnp.dot(x, w_ref[...], preferred_element_type=jnp.float32)
        + b_ref[...])                                  # (16, 256) f32

    # ---- pad mask: flat row r (sentence b) valid iff r - b*T_MAX < len[b] --
    row = jax.lax.broadcasted_iota(jnp.int32, (BT, 1), 0)
    mask = jnp.zeros((BT, 1), jnp.float32)
    for b in range(B):                                 # static unroll over B
        in_sent = (row >= b * T_MAX) & (row < b * T_MAX + lens_ref[b])
        mask = jnp.where(in_sent, 1.0, mask)

    # ---- two lane-aligned stores: fused [fw|bw] (256 wide), glove (128) ----
    out_ref[:, 0:H2] = proj * mask
    out_ref[:, H2:EMB] = glove_sc[...] * mask


def flair_stack_and_pad(token_ids, lengths, char_tbl, glove_tbl, w, bias):
    """token_ids (B,T) i32, lengths (B,) i32, tables (V,128) f32,
       w (HC,256) bf16, bias (1,256) f32 -> (B, T, EMB) f32, pad rows zeroed."""
    ids_flat = token_ids.reshape(BT).astype(jnp.int32)
    grid_spec = pltpu.PrefetchScalarGridSpec(
        num_scalar_prefetch=2,        # lengths, token_ids -> SMEM
        grid=(1,),
        in_specs=[
            pl.BlockSpec((V, HC), lambda i, lens, ids: (0, 0)),
            pl.BlockSpec((V, HG), lambda i, lens, ids: (0, 0)),
            pl.BlockSpec((HC, H2), lambda i, lens, ids: (0, 0)),
            pl.BlockSpec((1, H2), lambda i, lens, ids: (0, 0)),
        ],
        out_specs=pl.BlockSpec((BT, EMB), lambda i, lens, ids: (0, 0)),
        scratch_shapes=[
            pltpu.VMEM((BT, HC), jnp.float32),   # gathered char features
            pltpu.VMEM((BT, HG), jnp.float32),   # gathered glove rows
        ],
    )
    out = pl.pallas_call(
        flair_fused_kernel,
        grid_spec=grid_spec,
        out_shape=jax.ShapeDtypeStruct((BT, EMB), jnp.float32),
        compiler_params=pltpu.CompilerParams(
            dimension_semantics=("arbitrary",)),
    )(lengths, ids_flat, char_tbl, glove_tbl, w, bias)
    return out.reshape(B, T_MAX, EMB)


# --------------------------------------------------------------------------
# Synthetic deterministic stand-ins for the pretrained flair embedders.
# --------------------------------------------------------------------------
def init_params(key):
    ks = jax.random.split(key, 4)
    return {
        # char-LM input-feature table (stand-in for the char-level LM input)
        "char_table":  jax.random.normal(ks[0], (V, HC), jnp.float32) * 0.1,
        # glove word embedding table stand-in
        "glove_table": jax.random.normal(ks[1], (V, HG), jnp.float32) * 0.1,
        # fused [fw | bw] LM projection: bf16 operands for the MXU, f32 bias
        # (columns 0:128 = forward LM, 128:256 = backward LM)
        "w": (jax.random.normal(ks[2], (HC, H2), jnp.float32) * 0.05
              ).astype(jnp.bfloat16),
        "b": jax.random.normal(ks[3], (1, H2), jnp.float32) * 0.05,
    }


def flair_embedder_forward(params, token_ids, lengths):
    """Replicates FlairEmbedder.forward after tokenization / model.embed.

    token_ids: (B, T_MAX) int32 (pad = 0), lengths: (B,) int32.
    Returns {'inner_states': [(B, T_MAX, EMB)]}  (n_hidden_states == 1).
    """
    # TODO(synk): real module builds flair Sentence objects from strings and
    #             runs pretrained char-LMs + glove; replaced by table lookups.
    vecs = flair_stack_and_pad(token_ids, lengths,
                               params["char_table"], params["glove_table"],
                               params["w"], params["b"])
    return {"inner_states": [vecs]}


# --------------------------------------------------------------------------
# Pure-JAX reference of the same math (for a correctness check).
# --------------------------------------------------------------------------
def reference_forward(params, token_ids, lengths):
    char_feat = jnp.take(params["char_table"], token_ids, axis=0)   # (B,T,HC)
    glove = jnp.take(params["glove_table"], token_ids, axis=0)      # (B,T,HG)
    xb = char_feat.astype(jnp.bfloat16)
    proj = jnp.tanh(jnp.einsum("btc,cf->btf", xb, params["w"],
                               preferred_element_type=jnp.float32)
                    + params["b"][None])
    stacked = jnp.concatenate([proj, glove], axis=-1)
    pos = jnp.arange(T_MAX, dtype=jnp.int32)[None, :, None]
    return jnp.where(pos < lengths[:, None, None], stacked, 0.0)


if __name__ == "__main__":
    key = jax.random.PRNGKey(0)
    k_par, k_tok = jax.random.split(key)
    params = init_params(k_par)

    # Deterministic synthetic batch: second sentence is shorter (padded).
    lengths = jnp.array([T_MAX, 5], dtype=jnp.int32)
    token_ids = jax.random.randint(k_tok, (B, T_MAX), 1, V, dtype=jnp.int32)
    pos = jnp.arange(T_MAX, dtype=jnp.int32)[None, :]
    token_ids = jnp.where(pos < lengths[:, None], token_ids, 0)  # <pad> -> 0

    out = flair_embedder_forward(params, token_ids, lengths)
    jax.block_until_ready(out)

    got = out["inner_states"][0]
    ref = reference_forward(params, token_ids, lengths)
    assert got.shape == (B, T_MAX, EMB)
    assert len(out["inner_states"]) == 1          # n_hidden_states == 1
    assert jnp.allclose(ref, got, atol=2e-3), "mismatch vs reference"
    # padded positions must be exactly zero (mirrors torch.zeros padding)
    assert float(jnp.abs(got[1, 5:]).max()) == 0.0

    print("KERNEL_OK")
</pallas_src>

<mosaic_0001>
module attributes {stable_mosaic.version = 11 : i64} {
  func.func @flair_fused_kernel(%arg0: i32, %arg1: memref<2xi32, #tpu.memory_space<smem>>, %arg2: memref<16xi32, #tpu.memory_space<smem>>, %arg3: memref<128x128xf32, #tpu.memory_space<vmem>>, %arg4: memref<128x128xf32, #tpu.memory_space<vmem>>, %arg5: memref<128x256xbf16, #tpu.memory_space<vmem>>, %arg6: memref<1x256xf32, #tpu.memory_space<vmem>>, %arg7: memref<16x384xf32, #tpu.memory_space<vmem>>, %arg8: memref<16x128xf32, #tpu.memory_space<vmem>>, %arg9: memref<16x128xf32, #tpu.memory_space<vmem>>) attributes {dimension_semantics = [#tpu.dimension_semantics<arbitrary>], iteration_bounds = array<i64: 1>, scalar_prefetch = 2 : i64, scratch_operands = 2 : i64, tpu.core_type = #tpu.core_type<tc>, window_params = [{pipeline_mode = #tpu.pipeline_mode<synchronous>, transform_indices = @transform_0, window_bounds = array<i64: 128, 128>}, {pipeline_mode = #tpu.pipeline_mode<synchronous>, transform_indices = @transform_1, window_bounds = array<i64: 128, 128>}, {pipeline_mode = #tpu.pipeline_mode<synchronous>, transform_indices = @transform_2, window_bounds = array<i64: 128, 256>}, {pipeline_mode = #tpu.pipeline_mode<synchronous>, transform_indices = @transform_3, window_bounds = array<i64: 1, 256>}, {pipeline_mode = #tpu.pipeline_mode<synchronous>, transform_indices = @transform_4, window_bounds = array<i64: 16, 384>}]} {
    %c0 = arith.constant 0 : index
    %0 = memref.load %arg2[%c0] : memref<16xi32, #tpu.memory_space<smem>>
    %1 = arith.index_cast %0 : i32 to index
    %c0_0 = arith.constant 0 : index
    %2 = vector.load %arg3[%1, %c0_0] : memref<128x128xf32, #tpu.memory_space<vmem>>, vector<1x128xf32>
    %c0_1 = arith.constant 0 : index
    %c0_2 = arith.constant 0 : index
    %3 = vector.load %arg8[%c0_1, %c0_2] : memref<16x128xf32, #tpu.memory_space<vmem>>, vector<1x128xf32>
    tpu.vector_store %arg8[%c0_1, %c0_2], %2 {strides = array<i32>} : memref<16x128xf32, #tpu.memory_space<vmem>>, vector<1x128xf32>,
    %4 = arith.index_cast %0 : i32 to index
    %c0_3 = arith.constant 0 : index
    %5 = vector.load %arg4[%4, %c0_3] : memref<128x128xf32, #tpu.memory_space<vmem>>, vector<1x128xf32>
    %c0_4 = arith.constant 0 : index
    %c0_5 = arith.constant 0 : index
    %6 = vector.load %arg9[%c0_4, %c0_5] : memref<16x128xf32, #tpu.memory_space<vmem>>, vector<1x128xf32>
    tpu.vector_store %arg9[%c0_4, %c0_5], %5 {strides = array<i32>} : memref<16x128xf32, #tpu.memory_space<vmem>>, vector<1x128xf32>,
    %c1 = arith.constant 1 : index
    %7 = memref.load %arg2[%c1] : memref<16xi32, #tpu.memory_space<smem>>
    %8 = arith.index_cast %7 : i32 to index
    %c0_6 = arith.constant 0 : index
    %9 = vector.load %arg3[%8, %c0_6] : memref<128x128xf32, #tpu.memory_space<vmem>>, vector<1x128xf32>
    %c1_7 = arith.constant 1 : index
    %c0_8 = arith.constant 0 : index
    %10 = vector.load %arg8[%c1_7, %c0_8] : memref<16x128xf32, #tpu.memory_space<vmem>>, vector<1x128xf32>
    tpu.vector_store %arg8[%c1_7, %c0_8], %9 {strides = array<i32>} : memref<16x128xf32, #tpu.memory_space<vmem>>, vector<1x128xf32>,
    %11 = arith.index_cast %7 : i32 to index
    %c0_9 = arith.constant 0 : index
    %12 = vector.load %arg4[%11, %c0_9] : memref<128x128xf32, #tpu.memory_space<vmem>>, vector<1x128xf32>
    %c1_10 = arith.constant 1 : index
    %c0_11 = arith.constant 0 : index
    %13 = vector.load %arg9[%c1_10, %c0_11] : memref<16x128xf32, #tpu.memory_space<vmem>>, vector<1x128xf32>
    tpu.vector_store %arg9[%c1_10, %c0_11], %12 {strides = array<i32>} : memref<16x128xf32, #tpu.memory_space<vmem>>, vector<1x128xf32>,
    %c2 = arith.constant 2 : index
    %14 = memref.load %arg2[%c2] : memref<16xi32, #tpu.memory_space<smem>>
    %15 = arith.index_cast %14 : i32 to index
    %c0_12 = arith.constant 0 : index
    %16 = vector.load %arg3[%15, %c0_12] : memref<128x128xf32, #tpu.memory_space<vmem>>, vector<1x128xf32>
    %c2_13 = arith.constant 2 : index
    %c0_14 = arith.constant 0 : index
    %17 = vector.load %arg8[%c2_13, %c0_14] : memref<16x128xf32, #tpu.memory_space<vmem>>, vector<1x128xf32>
    tpu.vector_store %arg8[%c2_13, %c0_14], %16 {strides = array<i32>} : memref<16x128xf32, #tpu.memory_space<vmem>>, vector<1x128xf32>,
    %18 = arith.index_cast %14 : i32 to index
    %c0_15 = arith.constant 0 : index
    %19 = vector.load %arg4[%18, %c0_15] : memref<128x128xf32, #tpu.memory_space<vmem>>, vector<1x128xf32>
    %c2_16 = arith.constant 2 : index
    %c0_17 = arith.constant 0 : index
    %20 = vector.load %arg9[%c2_16, %c0_17] : memref<16x128xf32, #tpu.memory_space<vmem>>, vector<1x128xf32>
    tpu.vector_store %arg9[%c2_16, %c0_17], %19 {strides = array<i32>} : memref<16x128xf32, #tpu.memory_space<vmem>>, vector<1x128xf32>,
    %c3 = arith.constant 3 : index
    %21 = memref.load %arg2[%c3] : memref<16xi32, #tpu.memory_space<smem>>
    %22 = arith.index_cast %21 : i32 to index
    %c0_18 = arith.constant 0 : index
    %23 = vector.load %arg3[%22, %c0_18] : memref<128x128xf32, #tpu.memory_space<vmem>>, vector<1x128xf32>
    %c3_19 = arith.constant 3 : index
    %c0_20 = arith.constant 0 : index
    %24 = vector.load %arg8[%c3_19, %c0_20] : memref<16x128xf32, #tpu.memory_space<vmem>>, vector<1x128xf32>
    tpu.vector_store %arg8[%c3_19, %c0_20], %23 {strides = array<i32>} : memref<16x128xf32, #tpu.memory_space<vmem>>, vector<1x128xf32>,
    %25 = arith.index_cast %21 : i32 to index
    %c0_21 = arith.constant 0 : index
    %26 = vector.load %arg4[%25, %c0_21] : memref<128x128xf32, #tpu.memory_space<vmem>>, vector<1x128xf32>
    %c3_22 = arith.constant 3 : index
    %c0_23 = arith.constant 0 : index
    %27 = vector.load %arg9[%c3_22, %c0_23] : memref<16x128xf32, #tpu.memory_space<vmem>>, vector<1x128xf32>
    tpu.vector_store %arg9[%c3_22, %c0_23], %26 {strides = array<i32>} : memref<16x128xf32, #tpu.memory_space<vmem>>, vector<1x128xf32>,
    %c4 = arith.constant 4 : index
    %28 = memref.load %arg2[%c4] : memref<16xi32, #tpu.memory_space<smem>>
    %29 = arith.index_cast %28 : i32 to index
    %c0_24 = arith.constant 0 : index
    %30 = vector.load %arg3[%29, %c0_24] : memref<128x128xf32, #tpu.memory_space<vmem>>, vector<1x128xf32>
    %c4_25 = arith.constant 4 : index
    %c0_26 = arith.constant 0 : index
    %31 = vector.load %arg8[%c4_25, %c0_26] : memref<16x128xf32, #tpu.memory_space<vmem>>, vector<1x128xf32>
    tpu.vector_store %arg8[%c4_25, %c0_26], %30 {strides = array<i32>} : memref<16x128xf32, #tpu.memory_space<vmem>>, vector<1x128xf32>,
    %32 = arith.index_cast %28 : i32 to index
    %c0_27 = arith.constant 0 : index
    %33 = vector.load %arg4[%32, %c0_27] : memref<128x128xf32, #tpu.memory_space<vmem>>, vector<1x128xf32>
    %c4_28 = arith.constant 4 : index
    %c0_29 = arith.constant 0 : index
    %34 = vector.load %arg9[%c4_28, %c0_29] : memref<16x128xf32, #tpu.memory_space<vmem>>, vector<1x128xf32>
    tpu.vector_store %arg9[%c4_28, %c0_29], %33 {strides = array<i32>} : memref<16x128xf32, #tpu.memory_space<vmem>>, vector<1x128xf32>,
    %c5 = arith.constant 5 : index
    %35 = memref.load %arg2[%c5] : memref<16xi32, #tpu.memory_space<smem>>
    %36 = arith.index_cast %35 : i32 to index
    %c0_30 = arith.constant 0 : index
    %37 = vector.load %arg3[%36, %c0_30] : memref<128x128xf32, #tpu.memory_space<vmem>>, vector<1x128xf32>
    %c5_31 = arith.constant 5 : index
    %c0_32 = arith.constant 0 : index
    %38 = vector.load %arg8[%c5_31, %c0_32] : memref<16x128xf32, #tpu.memory_space<vmem>>, vector<1x128xf32>
    tpu.vector_store %arg8[%c5_31, %c0_32], %37 {strides = array<i32>} : memref<16x128xf32, #tpu.memory_space<vmem>>, vector<1x128xf32>,
    %39 = arith.index_cast %35 : i32 to index
    %c0_33 = arith.constant 0 : index
    %40 = vector.load %arg4[%39, %c0_33] : memref<128x128xf32, #tpu.memory_space<vmem>>, vector<1x128xf32>
    %c5_34 = arith.constant 5 : index
    %c0_35 = arith.constant 0 : index
    %41 = vector.load %arg9[%c5_34, %c0_35] : memref<16x128xf32, #tpu.memory_space<vmem>>, vector<1x128xf32>
    tpu.vector_store %arg9[%c5_34, %c0_35], %40 {strides = array<i32>} : memref<16x128xf32, #tpu.memory_space<vmem>>, vector<1x128xf32>,
    %c6 = arith.constant 6 : index
    %42 = memref.load %arg2[%c6] : memref<16xi32, #tpu.memory_space<smem>>
    %43 = arith.index_cast %42 : i32 to index
    %c0_36 = arith.constant 0 : index
    %44 = vector.load %arg3[%43, %c0_36] : memref<128x128xf32, #tpu.memory_space<vmem>>, vector<1x128xf32>
    %c6_37 = arith.constant 6 : index
    %c0_38 = arith.constant 0 : index
    %45 = vector.load %arg8[%c6_37, %c0_38] : memref<16x128xf32, #tpu.memory_space<vmem>>, vector<1x128xf32>
    tpu.vector_store %arg8[%c6_37, %c0_38], %44 {strides = array<i32>} : memref<16x128xf32, #tpu.memory_space<vmem>>, vector<1x128xf32>,
    %46 = arith.index_cast %42 : i32 to index
    %c0_39 = arith.constant 0 : index
    %47 = vector.load %arg4[%46, %c0_39] : memref<128x128xf32, #tpu.memory_space<vmem>>, vector<1x128xf32>
    %c6_40 = arith.constant 6 : index
    %c0_41 = arith.constant 0 : index
    %48 = vector.load %arg9[%c6_40, %c0_41] : memref<16x128xf32, #tpu.memory_space<vmem>>, vector<1x128xf32>
    tpu.vector_store %arg9[%c6_40, %c0_41], %47 {strides = array<i32>} : memref<16x128xf32, #tpu.memory_space<vmem>>, vector<1x128xf32>,
    %c7 = arith.constant 7 : index
    %49 = memref.load %arg2[%c7] : memref<16xi32, #tpu.memory_space<smem>>
    %50 = arith.index_cast %49 : i32 to index
    %c0_42 = arith.constant 0 : index
    %51 = vector.load %arg3[%50, %c0_42] : memref<128x128xf32, #tpu.memory_space<vmem>>, vector<1x128xf32>
    %c7_43 = arith.constant 7 : index
    %c0_44 = arith.constant 0 : index
    %52 = vector.load %arg8[%c7_43, %c0_44] : memref<16x128xf32, #tpu.memory_space<vmem>>, vector<1x128xf32>
    tpu.vector_store %arg8[%c7_43, %c0_44], %51 {strides = array<i32>} : memref<16x128xf32, #tpu.memory_space<vmem>>, vector<1x128xf32>,
    %53 = arith.index_cast %49 : i32 to index
    %c0_45 = arith.constant 0 : index
    %54 = vector.load %arg4[%53, %c0_45] : memref<128x128xf32, #tpu.memory_space<vmem>>, vector<1x128xf32>
    %c7_46 = arith.constant 7 : index
    %c0_47 = arith.constant 0 : index
    %55 = vector.load %arg9[%c7_46, %c0_47] : memref<16x128xf32, #tpu.memory_space<vmem>>, vector<1x128xf32>
    tpu.vector_store %arg9[%c7_46, %c0_47], %54 {strides = array<i32>} : memref<16x128xf32, #tpu.memory_space<vmem>>, vector<1x128xf32>,
    %c8 = arith.constant 8 : index
    %56 = memref.load %arg2[%c8] : memref<16xi32, #tpu.memory_space<smem>>
    %57 = arith.index_cast %56 : i32 to index
    %c0_48 = arith.constant 0 : index
    %58 = vector.load %arg3[%57, %c0_48] : memref<128x128xf32, #tpu.memory_space<vmem>>, vector<1x128xf32>
    %c8_49 = arith.constant 8 : index
    %c0_50 = arith.constant 0 : index
    %59 = vector.load %arg8[%c8_49, %c0_50] : memref<16x128xf32, #tpu.memory_space<vmem>>, vector<1x128xf32>
    tpu.vector_store %arg8[%c8_49, %c0_50], %58 {strides = array<i32>} : memref<16x128xf32, #tpu.memory_space<vmem>>, vector<1x128xf32>,
    %60 = arith.index_cast %56 : i32 to index
    %c0_51 = arith.constant 0 : index
    %61 = vector.load %arg4[%60, %c0_51] : memref<128x128xf32, #tpu.memory_space<vmem>>, vector<1x128xf32>
    %c8_52 = arith.constant 8 : index
    %c0_53 = arith.constant 0 : index
    %62 = vector.load %arg9[%c8_52, %c0_53] : memref<16x128xf32, #tpu.memory_space<vmem>>, vector<1x128xf32>
    tpu.vector_store %arg9[%c8_52, %c0_53], %61 {strides = array<i32>} : memref<16x128xf32, #tpu.memory_space<vmem>>, vector<1x128xf32>,
    %c9 = arith.constant 9 : index
    %63 = memref.load %arg2[%c9] : memref<16xi32, #tpu.memory_space<smem>>
    %64 = arith.index_cast %63 : i32 to index
    %c0_54 = arith.constant 0 : index
    %65 = vector.load %arg3[%64, %c0_54] : memref<128x128xf32, #tpu.memory_space<vmem>>, vector<1x128xf32>
    %c9_55 = arith.constant 9 : index
    %c0_56 = arith.constant 0 : index
    %66 = vector.load %arg8[%c9_55, %c0_56] : memref<16x128xf32, #tpu.memory_space<vmem>>, vector<1x128xf32>
    tpu.vector_store %arg8[%c9_55, %c0_56], %65 {strides = array<i32>} : memref<16x128xf32, #tpu.memory_space<vmem>>, vector<1x128xf32>,
    %67 = arith.index_cast %63 : i32 to index
    %c0_57 = arith.constant 0 : index
    %68 = vector.load %arg4[%67, %c0_57] : memref<128x128xf32, #tpu.memory_space<vmem>>, vector<1x128xf32>
    %c9_58 = arith.constant 9 : index
    %c0_59 = arith.constant 0 : index
    %69 = vector.load %arg9[%c9_58, %c0_59] : memref<16x128xf32, #tpu.memory_space<vmem>>, vector<1x128xf32>
    tpu.vector_store %arg9[%c9_58, %c0_59], %68 {strides = array<i32>} : memref<16x128xf32, #tpu.memory_space<vmem>>, vector<1x128xf32>,
    %c10 = arith.constant 10 : index
    %70 = memref.load %arg2[%c10] : memref<16xi32, #tpu.memory_space<smem>>
    %71 = arith.index_cast %70 : i32 to index
    %c0_60 = arith.constant 0 : index
    %72 = vector.load %arg3[%71, %c0_60] : memref<128x128xf32, #tpu.memory_space<vmem>>, vector<1x128xf32>
    %c10_61 = arith.constant 10 : index
    %c0_62 = arith.constant 0 : index
    %73 = vector.load %arg8[%c10_61, %c0_62] : memref<16x128xf32, #tpu.memory_space<vmem>>, vector<1x128xf32>
    tpu.vector_store %arg8[%c10_61, %c0_62], %72 {strides = array<i32>} : memref<16x128xf32, #tpu.memory_space<vmem>>, vector<1x128xf32>,
    %74 = arith.index_cast %70 : i32 to index
    %c0_63 = arith.constant 0 : index
    %75 = vector.load %arg4[%74, %c0_63] : memref<128x128xf32, #tpu.memory_space<vmem>>, vector<1x128xf32>
    %c10_64 = arith.constant 10 : index
    %c0_65 = arith.constant 0 : index
    %76 = vector.load %arg9[%c10_64, %c0_65] : memref<16x128xf32, #tpu.memory_space<vmem>>, vector<1x128xf32>
    tpu.vector_store %arg9[%c10_64, %c0_65], %75 {strides = array<i32>} : memref<16x128xf32, #tpu.memory_space<vmem>>, vector<1x128xf32>,
    %c11 = arith.constant 11 : index
    %77 = memref.load %arg2[%c11] : memref<16xi32, #tpu.memory_space<smem>>
    %78 = arith.index_cast %77 : i32 to index
    %c0_66 = arith.constant 0 : index
    %79 = vector.load %arg3[%78, %c0_66] : memref<128x128xf32, #tpu.memory_space<vmem>>, vector<1x128xf32>
    %c11_67 = arith.constant 11 : index
    %c0_68 = arith.constant 0 : index
    %80 = vector.load %arg8[%c11_67, %c0_68] : memref<16x128xf32, #tpu.memory_space<vmem>>, vector<1x128xf32>
    tpu.vector_store %arg8[%c11_67, %c0_68], %79 {strides = array<i32>} : memref<16x128xf32, #tpu.memory_space<vmem>>, vector<1x128xf32>,
    %81 = arith.index_cast %77 : i32 to index
    %c0_69 = arith.constant 0 : index
    %82 = vector.load %arg4[%81, %c0_69] : memref<128x128xf32, #tpu.memory_space<vmem>>, vector<1x128xf32>
    %c11_70 = arith.constant 11 : index
    %c0_71 = arith.constant 0 : index
    %83 = vector.load %arg9[%c11_70, %c0_71] : memref<16x128xf32, #tpu.memory_space<vmem>>, vector<1x128xf32>
    tpu.vector_store %arg9[%c11_70, %c0_71], %82 {strides = array<i32>} : memref<16x128xf32, #tpu.memory_space<vmem>>, vector<1x128xf32>,
    %c12 = arith.constant 12 : index
    %84 = memref.load %arg2[%c12] : memref<16xi32, #tpu.memory_space<smem>>
    %85 = arith.index_cast %84 : i32 to index
    %c0_72 = arith.constant 0 : index
    %86 = vector.load %arg3[%85, %c0_72] : memref<128x128xf32, #tpu.memory_space<vmem>>, vector<1x128xf32>
    %c12_73 = arith.constant 12 : index
    %c0_74 = arith.constant 0 : index
    %87 = vector.load %arg8[%c12_73, %c0_74] : memref<16x128xf32, #tpu.memory_space<vmem>>, vector<1x128xf32>
    tpu.vector_store %arg8[%c12_73, %c0_74], %86 {strides = array<i32>} : memref<16x128xf32, #tpu.memory_space<vmem>>, vector<1x128xf32>,
    %88 = arith.index_cast %84 : i32 to index
    %c0_75 = arith.constant 0 : index
    %89 = vector.load %arg4[%88, %c0_75] : memref<128x128xf32, #tpu.memory_space<vmem>>, vector<1x128xf32>
    %c12_76 = arith.constant 12 : index
    %c0_77 = arith.constant 0 : index
    %90 = vector.load %arg9[%c12_76, %c0_77] : memref<16x128xf32, #tpu.memory_space<vmem>>, vector<1x128xf32>
    tpu.vector_store %arg9[%c12_76, %c0_77], %89 {strides = array<i32>} : memref<16x128xf32, #tpu.memory_space<vmem>>, vector<1x128xf32>,
    %c13 = arith.constant 13 : index
    %91 = memref.load %arg2[%c13] : memref<16xi32, #tpu.memory_space<smem>>
    %92 = arith.index_cast %91 : i32 to index
    %c0_78 = arith.constant 0 : index
    %93 = vector.load %arg3[%92, %c0_78] : memref<128x128xf32, #tpu.memory_space<vmem>>, vector<1x128xf32>
    %c13_79 = arith.constant 13 : index
    %c0_80 = arith.constant 0 : index
    %94 = vector.load %arg8[%c13_79, %c0_80] : memref<16x128xf32, #tpu.memory_space<vmem>>, vector<1x128xf32>
    tpu.vector_store %arg8[%c13_79, %c0_80], %93 {strides = array<i32>} : memref<16x128xf32, #tpu.memory_space<vmem>>, vector<1x128xf32>,
    %95 = arith.index_cast %91 : i32 to index
    %c0_81 = arith.constant 0 : index
    %96 = vector.load %arg4[%95, %c0_81] : memref<128x128xf32, #tpu.memory_space<vmem>>, vector<1x128xf32>
    %c13_82 = arith.constant 13 : index
    %c0_83 = arith.constant 0 : index
    %97 = vector.load %arg9[%c13_82, %c0_83] : memref<16x128xf32, #tpu.memory_space<vmem>>, vector<1x128xf32>
    tpu.vector_store %arg9[%c13_82, %c0_83], %96 {strides = array<i32>} : memref<16x128xf32, #tpu.memory_space<vmem>>, vector<1x128xf32>,
    %c14 = arith.constant 14 : index
    %98 = memref.load %arg2[%c14] : memref<16xi32, #tpu.memory_space<smem>>
    %99 = arith.index_cast %98 : i32 to index
    %c0_84 = arith.constant 0 : index
    %100 = vector.load %arg3[%99, %c0_84] : memref<128x128xf32, #tpu.memory_space<vmem>>, vector<1x128xf32>
    %c14_85 = arith.constant 14 : index
    %c0_86 = arith.constant 0 : index
    %101 = vector.load %arg8[%c14_85, %c0_86] : memref<16x128xf32, #tpu.memory_space<vmem>>, vector<1x128xf32>
    tpu.vector_store %arg8[%c14_85, %c0_86], %100 {strides = array<i32>} : memref<16x128xf32, #tpu.memory_space<vmem>>, vector<1x128xf32>,
    %102 = arith.index_cast %98 : i32 to index
    %c0_87 = arith.constant 0 : index
    %103 = vector.load %arg4[%102, %c0_87] : memref<128x128xf32, #tpu.memory_space<vmem>>, vector<1x128xf32>
    %c14_88 = arith.constant 14 : index
    %c0_89 = arith.constant 0 : index
    %104 = vector.load %arg9[%c14_88, %c0_89] : memref<16x128xf32, #tpu.memory_space<vmem>>, vector<1x128xf32>
    tpu.vector_store %arg9[%c14_88, %c0_89], %103 {strides = array<i32>} : memref<16x128xf32, #tpu.memory_space<vmem>>, vector<1x128xf32>,
    %c15 = arith.constant 15 : index
    %105 = memref.load %arg2[%c15] : memref<16xi32, #tpu.memory_space<smem>>
    %106 = arith.index_cast %105 : i32 to index
    %c0_90 = arith.constant 0 : index
    %107 = vector.load %arg3[%106, %c0_90] : memref<128x128xf32, #tpu.memory_space<vmem>>, vector<1x128xf32>
    %c15_91 = arith.constant 15 : index
    %c0_92 = arith.constant 0 : index
    %108 = vector.load %arg8[%c15_91, %c0_92] : memref<16x128xf32, #tpu.memory_space<vmem>>, vector<1x128xf32>
    tpu.vector_store %arg8[%c15_91, %c0_92], %107 {strides = array<i32>} : memref<16x128xf32, #tpu.memory_space<vmem>>, vector<1x128xf32>,
    %109 = arith.index_cast %105 : i32 to index
    %c0_93 = arith.constant 0 : index
    %110 = vector.load %arg4[%109, %c0_93] : memref<128x128xf32, #tpu.memory_space<vmem>>, vector<1x128xf32>
    %c15_94 = arith.constant 15 : index
    %c0_95 = arith.constant 0 : index
    %111 = vector.load %arg9[%c15_94, %c0_95] : memref<16x128xf32, #tpu.memory_space<vmem>>, vector<1x128xf32>
    tpu.vector_store %arg9[%c15_94, %c0_95], %110 {strides = array<i32>} : memref<16x128xf32, #tpu.memory_space<vmem>>, vector<1x128xf32>,
    %c0_96 = arith.constant 0 : index
    %c0_97 = arith.constant 0 : index
    %112 = vector.load %arg8[%c0_96, %c0_97] : memref<16x128xf32, #tpu.memory_space<vmem>>, vector<16x128xf32>
    %113 = arith.truncf %112 : vector<16x128xf32> to vector<16x128xbf16>
    %c0_98 = arith.constant 0 : index
    %c0_99 = arith.constant 0 : index
    %114 = vector.load %arg5[%c0_98, %c0_99] : memref<128x256xbf16, #tpu.memory_space<vmem>>, vector<128x256xbf16>
    %cst = arith.constant dense<0.000000e+00> : vector<16x256xf32>
    %115 = tpu.matmul %113, %114, %cst {dimension_numbers = #tpu.dot_dimension_numbers<[1], [0], [0], [1], [0, 0, 1, 1], [], []>} : vector<16x128xbf16>, vector<128x256xbf16>, vector<16x256xf32> -> vector<16x256xf32>
    %c0_100 = arith.constant 0 : index
    %c0_101 = arith.constant 0 : index
    %116 = vector.load %arg6[%c0_100, %c0_101] : memref<1x256xf32, #tpu.memory_space<vmem>>, vector<1x256xf32>
    %117 = vector.broadcast %116 : vector<1x256xf32> to vector<16x256xf32>
    %118 = arith.addf %115, %117 : vector<16x256xf32>
    %119 = math.tanh %118 : vector<16x256xf32>
    %120 = tpu.iota {dimensions = array<i32: 0>} : vector<16x1xi32>
    %cst_102 = arith.constant 0.000000e+00 : f32
    %121 = vector.broadcast %cst_102 : f32 to vector<16x1xf32>
    %c0_i32 = arith.constant 0 : i32
    %122 = vector.broadcast %c0_i32 : i32 to vector<16x1xi32>
    %123 = arith.cmpi sge, %120, %122 : vector<16x1xi32>
    %c0_103 = arith.constant 0 : index
    %124 = memref.load %arg1[%c0_103] : memref<2xi32, #tpu.memory_space<smem>>
    %c0_i32_104 = arith.constant 0 : i32
    %125 = arith.addi %c0_i32_104, %124 : i32
    %126 = vector.broadcast %125 : i32 to vector<16x1xi32>
    %127 = arith.cmpi slt, %120, %126 : vector<16x1xi32>
    %128 = arith.andi %123, %127 : vector<16x1xi1>
    %cst_105 = arith.constant 1.000000e+00 : f32
    %129 = vector.broadcast %cst_105 : f32 to vector<16x1xf32>
    %130 = arith.select %128, %129, %121 : vector<16x1xi1>, vector<16x1xf32>
    %c8_i32 = arith.constant 8 : i32
    %131 = vector.broadcast %c8_i32 : i32 to vector<16x1xi32>
    %132 = arith.cmpi sge, %120, %131 : vector<16x1xi32>
    %c1_106 = arith.constant 1 : index
    %133 = memref.load %arg1[%c1_106] : memref<2xi32, #tpu.memory_space<smem>>
    %c8_i32_107 = arith.constant 8 : i32
    %134 = arith.addi %c8_i32_107, %133 : i32
    %135 = vector.broadcast %134 : i32 to vector<16x1xi32>
    %136 = arith.cmpi slt, %120, %135 : vector<16x1xi32>
    %137 = arith.andi %132, %136 : vector<16x1xi1>
    %cst_108 = arith.constant 1.000000e+00 : f32
    %138 = vector.broadcast %cst_108 : f32 to vector<16x1xf32>
    %139 = arith.select %137, %138, %130 : vector<16x1xi1>, vector<16x1xf32>
    %140 = vector.broadcast %139 : vector<16x1xf32> to vector<16x256xf32>
    %141 = arith.mulf %119, %140 : vector<16x256xf32>
    %c0_109 = arith.constant 0 : index
    %c0_110 = arith.constant 0 : index
    %142 = vector.load %arg7[%c0_109, %c0_110] : memref<16x384xf32, #tpu.memory_space<vmem>>, vector<16x256xf32>
    tpu.vector_store %arg7[%c0_109, %c0_110], %141 {strides = array<i32>} : memref<16x384xf32, #tpu.memory_space<vmem>>, vector<16x256xf32>,
    %c0_111 = arith.constant 0 : index
    %c0_112 = arith.constant 0 : index
    %143 = vector.load %arg9[%c0_111, %c0_112] : memref<16x128xf32, #tpu.memory_space<vmem>>, vector<16x128xf32>
    %144 = vector.broadcast %139 : vector<16x1xf32> to vector<16x128xf32>
    %145 = arith.mulf %143, %144 : vector<16x128xf32>
    %c0_113 = arith.constant 0 : index
    %c256 = arith.constant 256 : index
    %146 = vector.load %arg7[%c0_113, %c256] : memref<16x384xf32, #tpu.memory_space<vmem>>, vector<16x128xf32>
    tpu.vector_store %arg7[%c0_113, %c256], %145 {strides = array<i32>} : memref<16x384xf32, #tpu.memory_space<vmem>>, vector<16x128xf32>,
    return
  }
  func.func @transform_0(%arg0: i32, %arg1: memref<2xi32, #tpu.memory_space<smem>>, %arg2: memref<16xi32, #tpu.memory_space<smem>>) -> (i32, i32) {
    %c0_i32 = arith.constant 0 : i32
    %c0_i32_0 = arith.constant 0 : i32
    %c0_i32_1 = arith.constant 0 : i32
    return %c0_i32, %c0_i32_0 : i32, i32
  }
  func.func @transform_1(%arg0: i32, %arg1: memref<2xi32, #tpu.memory_space<smem>>, %arg2: memref<16xi32, #tpu.memory_space<smem>>) -> (i32, i32) {
    %c0_i32 = arith.constant 0 : i32
    %c0_i32_0 = arith.constant 0 : i32
    %c0_i32_1 = arith.constant 0 : i32
    return %c0_i32, %c0_i32_0 : i32, i32
  }
  func.func @transform_2(%arg0: i32, %arg1: memref<2xi32, #tpu.memory_space<smem>>, %arg2: memref<16xi32, #tpu.memory_space<smem>>) -> (i32, i32) {
    %c0_i32 = arith.constant 0 : i32
    %c0_i32_0 = arith.constant 0 : i32
    %c0_i32_1 = arith.constant 0 : i32
    return %c0_i32, %c0_i32_0 : i32, i32
  }
  func.func @transform_3(%arg0: i32, %arg1: memref<2xi32, #tpu.memory_space<smem>>, %arg2: memref<16xi32, #tpu.memory_space<smem>>) -> (i32, i32) {
    %c0_i32 = arith.constant 0 : i32
    %c0_i32_0 = arith.constant 0 : i32
    %c0_i32_1 = arith.constant 0 : i32
    return %c0_i32, %c0_i32_0 : i32, i32
  }
  func.func @transform_4(%arg0: i32, %arg1: memref<2xi32, #tpu.memory_space<smem>>, %arg2: memref<16xi32, #tpu.memory_space<smem>>) -> (i32, i32) {
    %c0_i32 = arith.constant 0 : i32
    %c0_i32_0 = arith.constant 0 : i32
    %c0_i32_1 = arith.constant 0 : i32
    return %c0_i32, %c0_i32_0 : i32, i32
  }
}

</mosaic_0001>

<bundles_post_ra>
// kernel: tpu_custom_call.1
= control target key start
LH: loop header
LB: loop body
LE: loop exit
PB: predicated region body
PF: predicated region fallthrough
CT: control target
= control target key end

     0   :  { %s821_s0 = inlined_call_operand.hbm [shape: s32[2], index: 0, kind: input, shape index: {}]   ;;  %s822_s2 = inlined_call_operand.hbm [shape: f32[128,128], index: 2, kind: input, shape index: {}]   ;;  %s823_s3 = inlined_call_operand.hbm [shape: f32[128,128], index: 3, kind: input, shape index: {}]   ;;  %s824_s4 = inlined_call_operand.hbm [shape: bf16[128,256], index: 4, kind: input, shape index: {}]   ;;  %s825_s5 = inlined_call_operand.vmem [shape: f32[1,256], index: 5, kind: input, shape index: {}]   ;;  %s826_s6 = inlined_call_operand.hbm [shape: f32[16,384], index: 6, kind: output, shape index: {}]   ;;  %s827_s1 = inlined_call_operand.vmem [shape: s32[16], index: 1, kind: input, shape index: {}]  }
   0x1   :  { %s504_s23 = scalar_lea.hbm %s821_s0, 16 }
   0x2   :  { %p505_p0 = scmp.ne.s32.totalorder %s821_s0, %s504_s23  ;;  %p508_p1 = scmp.lt.u32.totalorder %s504_s23, %s821_s0 }
   0x4   :  { %p510_p2 = pnand %p508_p1, %p505_p0 }
   0x6   :  { %513 = shalt.err (!%p510_p2)  }
   0x7   :  { %s622_s28 = smov [#allocation5]   ;;  %s13_s9 = sshll.u32 %s827_s1, 4  ;;  %s14_s9 = int_to_ptr.vmem [resolvable:$true] %s13_s9 }
   0x8   :  { %12 = dma.hbm_to_smem %s821_s0, 16, %s622_s28, [#allocation4] }
   0x9   :  { %s514_s10 = scalar_lea.vmem %s14_s9, 16  ;;  %p519_p4 = scmp.lt.s32.totalorder %s14_s9, %s14_s9 }
   0xa   :  { %p515_p3 = scmp.ne.s32.totalorder %s14_s9, %s514_s10  ;;  %p520_p5 = scmp.lt.s32.totalorder %s514_s10, %s514_s10 }
   0xc   :  { %p521_p6 = por %p520_p5, %p519_p4 }
   0xe   :  { %p522_p7 = pnand %p521_p6, %p515_p3 }
  0x10   :  { %525 = shalt.err (!%p522_p7)  }
  0x11   :  { %s623_s11 = smov [#allocation6]  }
  0x12   :  { %16 = dma.vmem_to_smem %s14_s9, 16, %s623_s11, [#allocation4] }
  0x13   :  { %614 = dma.done.wait [#allocation4], 32 }
  0x14   :  { %615 = vsyncadd [#allocation4], 4294967264 }
  0x15   :  { %18 = sfence }
  0x16   :  { %19 = vsyncpa [#allocation8], 0 }
  0x17   :  { %20 = vsyncpa [#allocation11], 0 }
  0x18   :  { %21 = vsyncpa [#allocation9], 0  ;;  %s624_s0 = smov [#allocation10]   ;;  %s625_s13 = smov [#allocation7]  }
  0x19   :  { %s39_s12 = sshll.u32 %s624_s0, 4  ;;  %s27_s1 = sshll.u32 %s625_s13, 4  ;;  %s40_s12 = int_to_ptr.vmem [resolvable:$true] %s39_s12  ;;  %s684_s1 = int_to_ptr.vmem [resolvable:$true] %s27_s1 }
  0x1a   :  { %s526_s16 = scalar_lea.hbm %s823_s3, 2048 }
  0x1b   :  { %p527_p8 = scmp.ne.s32.totalorder %s823_s3, %s526_s16  ;;  %p530_p9 = scmp.lt.u32.totalorder %s526_s16, %s823_s3 }
  0x1d   :  { %p532_p10 = pnand %p530_p9, %p527_p8 }
  0x1f   :  { %535 = shalt.err (!%p532_p10)
}
  0x20   :  { %s536_s21 = scalar_lea.vmem %s40_s12, 2048  ;;  %p541_p12 = scmp.lt.s32.totalorder %s40_s12, %s40_s12 }
  0x21   :  { %p537_p11 = scmp.ne.s32.totalorder %s40_s12, %s536_s21  ;;  %p542_p13 = scmp.lt.s32.totalorder %s536_s21, %s536_s21 }
  0x23   :  { %p543_p0 = por %p542_p13, %p541_p12 }
  0x25   :  { %p544_p1 = pnand %p543_p0, %p537_p11 }
  0x27   :  { %547 = shalt.err (!%p544_p1)
}
  0x28   :  { %s626_s22 = smov 128   ;;  %s627_s23 = smov 8  }
  0x29   :  { %45 = dma.hbm_to_vmem [thread:$0]  %s823_s3, 2048, %s40_s12, [#allocation11], %s626_s22, %s626_s22, %s627_s23  }
  0x2a   :  { %s548_s28 = scalar_lea.hbm %s822_s2, 2048 }
  0x2b   :  { %p549_p2 = scmp.ne.s32.totalorder %s822_s2, %s548_s28  ;;  %p552_p3 = scmp.lt.u32.totalorder %s548_s28, %s822_s2 }
  0x2d   :  { %p554_p4 = pnand %p552_p3, %p549_p2 }
  0x2f   :  { %557 = shalt.err (!%p554_p4)
}
  0x30   :  { %s558_s9 = scalar_lea.vmem %s684_s1, 2048  ;;  %p563_p6 = scmp.lt.s32.totalorder %s684_s1, %s684_s1 }
  0x31   :  { %p559_p5 = scmp.ne.s32.totalorder %s684_s1, %s558_s9  ;;  %p564_p7 = scmp.lt.s32.totalorder %s558_s9, %s558_s9 }
  0x33   :  { %p565_p8 = por %p564_p7, %p563_p6 }
  0x35   :  { %p566_p9 = pnand %p565_p8, %p559_p5 }
  0x37   :  { %569 = shalt.err (!%p566_p9)
}
  0x38   :  { %33 = dma.hbm_to_vmem [thread:$0]  %s822_s2, 2048, %s684_s1, [#allocation8], %s626_s22, %s626_s22, %s627_s23  }
  0x39   :  { %s628_s11 = smov [#allocation12]   ;;  %s570_s14 = scalar_lea.hbm %s824_s4, 2048 }
  0x3a   :  { %s51_s0 = sshll.u32 %s628_s11, 4  ;;  %p571_p10 = scmp.ne.s32.totalorder %s824_s4, %s570_s14  ;;  %s52_s0 = int_to_ptr.vmem [resolvable:$true] %s51_s0 }
  0x3b   :  { %p574_p11 = scmp.lt.u32.totalorder %s570_s14, %s824_s4 }
  0x3d   :  { %p576_p12 = pnand %p574_p11, %p571_p10 }
  0x3f   :  { %579 = shalt.err (!%p576_p12)
}
  0x40   :  { %s580_s19 = scalar_lea.vmem %s52_s0, 2048  ;;  %p585_p0 = scmp.lt.s32.totalorder %s52_s0, %s52_s0 }
  0x41   :  { %p581_p13 = scmp.ne.s32.totalorder %s52_s0, %s580_s19  ;;  %p586_p1 = scmp.lt.s32.totalorder %s580_s19, %s580_s19 }
  0x43   :  { %p587_p2 = por %p586_p1, %p585_p0 }
  0x45   :  { %p588_p3 = pnand %p587_p2, %p581_p13 }
  0x47   :  { %591 = shalt.err (!%p588_p3)
}
  0x48   :  { %57 = dma.hbm_to_vmem [thread:$0]  %s824_s4, 2048, %s52_s0, [#allocation11], %s626_s22, %s626_s22, %s627_s23  }
  0x49   :  { %616 = dma.done.wait [#allocation8], 2048  }
  0x4a   :  { %617 = vsyncadd [#allocation8], 4294965248 }
  0x4b   :  { %618 = dma.done.wait [#allocation11], 4096  }
  0x4c   :  { %619 = vsyncadd [#allocation11], 4294963200  ;;  %v629_v0 = vmov 0   ;;  %s736_s20 = sld [smem:[#allocation6]]  ;;  %s738_s21 = sld [smem:[#allocation6 + $0x1]]  ;;  %v203_v44 = vlaneseq  ;;  %v630_v57 = vmov 0.0  }
  0x4d   :  { %325 = vmatprep.mubr.bf16.mxu0 %v629_v0  ;;  %s740_s24 = sld [smem:[#allocation6 + $0x2]]  ;;  %s742_s25 = sld [smem:[#allocation6 + $0x3]]  ;;  %v472_v1 = vld [vmem:[#allocation12 + $0x4] ss:$8 sps:$4 sm:$0xff]   ;;  %v474_v2 = vld [vmem:[#allocation12] ss:$8 sps:$4 sm:$0xff]  }
  0x4e   :  { %s744_s26 = sld [smem:[#allocation6 + $0x4]]  ;;  %s746_s27 = sld [smem:[#allocation6 + $0x5]]  ;;  %293 = vmatprep.subr.bf16.mxu0 %v472_v1  ;;  %v475_v3 = vld [vmem:[#allocation12 + $0x14] ss:$8 sps:$4 sm:$0xff]   ;;  %v477_v4 = vld [vmem:[#allocation12 + $0x10] ss:$8 sps:$4 sm:$0xff]  }
  0x4f   :  { %s748_s28 = sld [smem:[#allocation6 + $0x6]]  ;;  %s750_s4 = sld [smem:[#allocation6 + $0x7]]  ;;  %294 = vmatpush1.bf16.msra.mxu0 %v474_v2  ;;  %v478_v5 = vld [vmem:[#allocation12 + $0x24] ss:$8 sps:$4 sm:$0xff]   ;;  %v480_v6 = vld [vmem:[#allocation12 + $0x20] ss:$8 sps:$4 sm:$0xff]  }
  0x50   :  { %s752_s22 = sld [smem:[#allocation6 + $0x8]]  ;;  %s754_s23 = sld [smem:[#allocation6 + $0x9]]  ;;  %295 = vmatprep.subr.bf16.mxu0 %v475_v3  ;;  %v481_v7 = vld [vmem:[#allocation12 + $0x34] ss:$8 sps:$4 sm:$0xff]   ;;  %v483_v8 = vld [vmem:[#allocation12 + $0x30] ss:$8 sps:$4 sm:$0xff]  }
  0x51   :  { %s756_s29 = sld [smem:[#allocation6 + $0xa]]  ;;  %s758_s30 = sld [smem:[#allocation6 + $0xb]]  ;;  %v484_v9 = vld [vmem:[#allocation12 + $0x44] ss:$8 sps:$4 sm:$0xff]   ;;  %v486_v17 = vld [vmem:[#allocation12 + $0x40] ss:$8 sps:$4 sm:$0xff]  }
  0x52   :  { %s71_s7 = scalar_lea.vmem [#allocation7], %s736_s20  ;;  %s78_s8 = scalar_lea.vmem [#allocation7], %s738_s21  ;;  %v487_v20 = vld [vmem:[#allocation12 + $0x54] ss:$8 sps:$4 sm:$0xff]   ;;  %v489_v27 = vld [vmem:[#allocation12 + $0x50] ss:$8 sps:$4 sm:$0xff]  }
  0x53   :  { %296 = vmatpush1.bf16.msra.mxu0 %v477_v4  ;;  %v72_v10 = vld [vmem:[%s71_s7] sm:$0x1]  ;;  %s85_s9 = scalar_lea.vmem [#allocation7], %s740_s24  ;;  %s92_s3 = scalar_lea.vmem [#allocation7], %s742_s25  ;;  %v490_v33 = vld [vmem:[#allocation12 + $0x64] ss:$8 sps:$4 sm:$0xff]  }
  0x54   :  { %297 = vmatprep.subr.bf16.mxu0 %v478_v5  ;;  %73 = vst [vmem:[#allocation2] sm:$0x1] %v72_v10  ;;  %v79_v11 = vld [vmem:[%s78_s8] sm:$0x1]  ;;  %s99_s10 = scalar_lea.vmem [#allocation7], %s744_s26  ;;  %s106_s11 = scalar_lea.vmem [#allocation7], %s746_s27 }
  0x55   :  { %v86_v12 = vld [vmem:[%s85_s9] sm:$0x1]  ;;  %80 = vst [vmem:[#allocation2 + $0x1] sm:$0x1] %v79_v11  ;;  %s113_s0 = scalar_lea.vmem [#allocation7], %s748_s28  ;;  %s120_s12 = scalar_lea.vmem [#allocation7], %s750_s4 }
  0x56   :  { %v93_v13 = vld [vmem:[%s92_s3] sm:$0x1]  ;;  %87 = vst [vmem:[#allocation2 + $0x2] sm:$0x1] %v86_v12  ;;  %s74_s13 = scalar_lea.vmem [#allocation10], %s736_s20  ;;  %s127_s14 = scalar_lea.vmem [#allocation7], %s752_s22 }
  0x57   :  { %298 = vmatpush1.bf16.msra.mxu0 %v480_v6  ;;  %94 = vst [vmem:[#allocation2 + $0x3] sm:$0x1] %v93_v13  ;;  %v100_v14 = vld [vmem:[%s99_s10] sm:$0x1]  ;;  %s81_s15 = scalar_lea.vmem [#allocation10], %s738_s21  ;;  %s134_s16 = scalar_lea.vmem [#allocation7], %s754_s23 }
  0x58   :  { %299 = vmatprep.subr.bf16.mxu0 %v481_v7  ;;  %v107_v15 = vld [vmem:[%s106_s11] sm:$0x1]  ;;  %101 = vst [vmem:[#allocation2 + $0x4] sm:$0x1] %v100_v14  ;;  %s88_s17 = scalar_lea.vmem [#allocation10], %s740_s24  ;;  %s141_s18 = scalar_lea.vmem [#allocation7], %s756_s29 }
  0x59   :  { %v114_v16 = vld [vmem:[%s113_s0] sm:$0x1]  ;;  %108 = vst [vmem:[#allocation2 + $0x5] sm:$0x1] %v107_v15  ;;  %s95_s19 = scalar_lea.vmem [#allocation10], %s742_s25  ;;  %s148_s2 = scalar_lea.vmem [#allocation7], %s758_s30 }
  0x5a   :  { %115 = vst [vmem:[#allocation2 + $0x6] sm:$0x1] %v114_v16  ;;  %v121_v18 = vld [vmem:[%s120_s12] sm:$0x1]  ;;  %s776_s1 = sld [smem:[#allocation6 + $0xc]]  ;;  %s778_s20 = sld [smem:[#allocation6 + $0xd]] }
  0x5b   :  { %v75_v19 = vld [vmem:[%s74_s13] sm:$0x1]  ;;  %122 = vst [vmem:[#allocation2 + $0x7] sm:$0x1] %v121_v18  ;;  %300 = vmatpush1.bf16.msra.mxu0 %v483_v8  ;;  %s780_s21 = sld [smem:[#allocation6 + $0xe]]  ;;  %s782_s24 = sld [smem:[#allocation6 + $0xf]] }
  0x5c   :  { %v128_v21 = vld [vmem:[%s127_s14] sm:$0x1]  ;;  %76 = vst [vmem:[#allocation3] sm:$0x1] %v75_v19  ;;  %301 = vmatprep.subr.bf16.mxu0 %v484_v9  ;;  %s102_s7 = scalar_lea.vmem [#allocation10], %s744_s26  ;;  %s109_s25 = scalar_lea.vmem [#allocation10], %s746_s27 }
  0x5d   :  { %v82_v22 = vld [vmem:[%s81_s15] sm:$0x1]  ;;  %129 = vst [vmem:[#allocation2 + $0x8] sm:$0x1] %v128_v21  ;;  %s116_s8 = scalar_lea.vmem [#allocation10], %s748_s28  ;;  %s123_s9 = scalar_lea.vmem [#allocation10], %s750_s4 }
  0x5e   :  { %v135_v23 = vld [vmem:[%s134_s16] sm:$0x1]  ;;  %83 = vst [vmem:[#allocation3 + $0x1] sm:$0x1] %v82_v22  ;;  %v492_v34 = vld [vmem:[#allocation12 + $0x60] ss:$8 sps:$4 sm:$0xff]  }
  0x5f   :  { %v89_v24 = vld [vmem:[%s88_s17] sm:$0x1]  ;;  %136 = vst [vmem:[#allocation2 + $0x9] sm:$0x1] %v135_v23  ;;  %302 = vmatpush1.bf16.msra.mxu0 %v486_v17  ;;  %v493_v35 = vld [vmem:[#allocation12 + $0x74] ss:$8 sps:$4 sm:$0xff]  }
  0x60   :  { %v142_v25 = vld [vmem:[%s141_s18] sm:$0x1]  ;;  %90 = vst [vmem:[#allocation3 + $0x2] sm:$0x1] %v89_v24  ;;  %303 = vmatprep.subr.bf16.mxu0 %v487_v20  ;;  %s155_s26 = scalar_lea.vmem [#allocation7], %s776_s1  ;;  %s162_s27 = scalar_lea.vmem [#allocation7], %s778_s20 }
  0x61   :  { %v96_v26 = vld [vmem:[%s95_s19] sm:$0x1]  ;;  %143 = vst [vmem:[#allocation2 + $0xa] sm:$0x1] %v142_v25  ;;  %s169_s28 = scalar_lea.vmem [#allocation7], %s780_s21  ;;  %s176_s4 = scalar_lea.vmem [#allocation7], %s782_s24 }
  0x62   :  { %v149_v28 = vld [vmem:[%s148_s2] sm:$0x1]  ;;  %97 = vst [vmem:[#allocation3 + $0x3] sm:$0x1] %v96_v26  ;;  %v182_v41 = vld [vmem:[#allocation2] sm:$0xff]  ;;  %s792_s3 = sld [smem:[#allocation5]] }
  0x63   :  { %150 = vst [vmem:[#allocation2 + $0xb] sm:$0x1] %v149_v28  ;;  %v103_v29 = vld [vmem:[%s102_s7] sm:$0x1]  ;;  %304 = vmatpush1.bf16.msra.mxu0 %v489_v27  ;;  %s794_s10 = sld [smem:[#allocation5 + $0x1]]  ;;  %v204_v45 = vshrl.u32 %v203_v44, 7 }
  0x64   :  { %104 = vst [vmem:[#allocation3 + $0x4] sm:$0x1] %v103_v29  ;;  %v110_v30 = vld [vmem:[%s109_s25] sm:$0x1]  ;;  %305 = vmatprep.subr.bf16.mxu0 %v490_v33  ;;  %s130_s11 = scalar_lea.vmem [#allocation10], %s752_s22  ;;  %s137_s0 = scalar_lea.vmem [#allocation10], %s754_s23 }
  0x65   :  { %v117_v31 = vld [vmem:[%s116_s8] sm:$0x1]  ;;  %111 = vst [vmem:[#allocation3 + $0x5] sm:$0x1] %v110_v30  ;;  %s144_s12 = scalar_lea.vmem [#allocation10], %s756_s29  ;;  %s151_s13 = scalar_lea.vmem [#allocation10], %s758_s30 }
  0x66   :  { %v124_v32 = vld [vmem:[%s123_s9] sm:$0x1]  ;;  %118 = vst [vmem:[#allocation3 + $0x6] sm:$0x1] %v117_v31  ;;  %s158_s14 = scalar_lea.vmem [#allocation10], %s776_s1  ;;  %s165_s15 = scalar_lea.vmem [#allocation10], %s778_s20 }
  0x67   :  { %125 = vst [vmem:[#allocation3 + $0x7] sm:$0x1] %v124_v32  ;;  %v156_v36 = vld [vmem:[%s155_s26] sm:$0x1]  ;;  %306 = vmatpush1.bf16.msra.mxu0 %v492_v34  ;;  %s172_s22 = scalar_lea.vmem [#allocation10], %s780_s21  ;;  %s179_s23 = scalar_lea.vmem [#allocation10], %s782_s24 }
  0x68   :  { %157 = vst [vmem:[#allocation2 + $0xc] sm:$0x1] %v156_v36  ;;  %v163_v37 = vld [vmem:[%s162_s27] sm:$0x1]  ;;  %307 = vmatprep.subr.bf16.mxu0 %v493_v35  ;;  %v346_v52 = vstv %s792_s3  ;;  %v342_v55 = vadd.s32 8, %v204_v45  ;;  %v205_v1 = vsub.s32 0, %v204_v45 }
  0x69   :  { %164 = vst [vmem:[#allocation2 + $0xd] sm:$0x1] %v163_v37  ;;  %v170_v38 = vld [vmem:[%s169_s28] sm:$0x1]  ;;  %s356_s29 = sadd.s32 8, %s794_s10  ;;  %vm347_vm0 = vcmp.lt.s32.totalorder %v204_v45, %v346_v52  ;;  %v209_v3 = vsub.s32 1, %v204_v45 }
  0x6a   :  { %v495_v39 = vld [vmem:[#allocation12 + $0x70] ss:$8 sps:$4 sm:$0xff]   ;;  %171 = vst [vmem:[#allocation2 + $0xe] sm:$0x1] %v170_v38  ;;  %vm348_vm1 = vcmp.lt.s32.totalorder %v342_v55, %v346_v52  ;;  %v357_v56 = vstv %s356_s29  ;;  %v351_v59 = vsel %vm347_vm0, 1.0, %v630_v57  ;;  %s631_s17 = smov [#allocation13]  }
  0x6b   :  { %v177_v40 = vld [vmem:[%s176_s4] sm:$0x1]  ;;  %308 = vmatpush1.bf16.msra.mxu0 %v495_v39  ;;  %v352_v58 = vsel %vm348_vm1, 1.0, %v630_v57  ;;  %vm359_vm2 = vcmp.lt.s32.totalorder %v342_v55, %v357_v56  ;;  %s383_s18 = sshll.u32 %s631_s17, 4  ;;  %s384_s18 = int_to_ptr.vmem [resolvable:$true] %s383_s18 }
  0x6c   :  { %178 = vst [vmem:[#allocation2 + $0xf] sm:$0x1] %v177_v40  ;;  %v131_v46 = vld [vmem:[%s130_s11] sm:$0x1]  ;;  %v363_v61 = vsel %vm359_vm2, 1.0, %v352_v58  ;;  %p597_p5 = scmp.lt.s32.totalorder %s384_s18, %s384_s18 }
  0x6d   :  { %v138_v47 = vld [vmem:[%s137_s0] sm:$0x1]  ;;  %132 = vst [vmem:[#allocation3 + $0x8] sm:$0x1] %v131_v46 }
  0x6e   :  { %v145_v48 = vld [vmem:[%s144_s12] sm:$0x1]  ;;  %139 = vst [vmem:[#allocation3 + $0x9] sm:$0x1] %v138_v47  ;;  %v372_v60 = vld [vmem:[#allocation3] sm:$0xff] }
  0x6f   :  { %146 = vst [vmem:[#allocation3 + $0xa] sm:$0x1] %v145_v48  ;;  %v152_v49 = vld [vmem:[%s151_s13] sm:$0x1]  ;;  %v374_v62 = vmul.f32 %v372_v60, %v351_v59 }
  0x70   :  { %v159_v50 = vld [vmem:[%s158_s14] sm:$0x1]  ;;  %153 = vst [vmem:[#allocation3 + $0xb] sm:$0x1] %v152_v49 }
  0x71   :  { %v166_v51 = vld [vmem:[%s165_s15] sm:$0x1]  ;;  %160 = vst [vmem:[#allocation3 + $0xc] sm:$0x1] %v159_v50  ;;  %376 = vst [vmem:[#allocation13 + $0x10] sm:$0xff] %v374_v62 }
  0x72   :  { %167 = vst [vmem:[#allocation3 + $0xd] sm:$0x1] %v166_v51  ;;  %v173_v53 = vld [vmem:[%s172_s22] sm:$0x1] }
  0x73   :  { %v183_v42 = vld [vmem:[#allocation2 + $0x8] sm:$0xff]  ;;  %v180_v54 = vld [vmem:[%s179_s23] sm:$0x1]  ;;  %174 = vst [vmem:[#allocation3 + $0xe] sm:$0x1] %v173_v53 }
  0x74   :  { %v184_v43 = vpack.c.bf16 %v183_v42, %v182_v41  ;;  %181 = vst [vmem:[#allocation3 + $0xf] sm:$0x1] %v180_v54  ;;  %v201_v2 = vld [vmem:[%s825_s5] sm:$0x3]  ;;  %s592_s5 = scalar_lea.vmem %s384_s18, 768 }
  0x75   :  { %v206_v4 = vrot.slane %v201_v2, %v205_v1  ;;  %v210_v5 = vrot.slane %v201_v2, %v209_v3  ;;  %p593_p4 = scmp.ne.s32.totalorder %s384_s18, %s592_s5  ;;  %p598_p6 = scmp.lt.s32.totalorder %s592_s5, %s592_s5 }
  0x76   :  { %326 = vmatmul.mubr.bf16.vlgmr.msra.gmra.mrb[0].mxu0 %v184_v43 }
  0x77   :  { %p599_p7 = por %p598_p6, %p597_p5 }
  0x79   :  { %p600_p8 = pnand %p599_p7, %p593_p4 }
  0x7b   :  { %v373_v63 = vld [vmem:[#allocation3 + $0x8] sm:$0xff] }
  0x7c   :  { %v375_v0 = vmul.f32 %v373_v63, %v363_v61 }
  0x7e   :  { %377 = vst [vmem:[#allocation13 + $0x28] sm:$0xff] %v375_v0 }
 0x149   :  { %v327_v6 = vpop.f32.mrb[0].mxu0 }
 0x14a   :  { %v328_v7 = vadd.f32 %v327_v6, %v206_v4  ;;  %v329_v8 = vpop.f32.mrb[1].mxu0 }
 0x14b   :  { %v330_v9 = vadd.f32 %v329_v8, %v210_v5  ;;  %v331_v10 = vpop.f32.mrb[2].mxu0 }
 0x14c   :  { %496 = vtanh.f32 %v328_v7  ;;  %v332_v11 = vadd.f32 %v331_v10, %v206_v4  ;;  %v333_v12 = vpop.f32.mrb[3].mxu0 }
 0x14d   :  { %498 = vtanh.f32 %v330_v9  ;;  %v334_v13 = vadd.f32 %v333_v12, %v210_v5 }
 0x14e   :  { %500 = vtanh.f32 %v332_v11 }
 0x14f   :  { %502 = vtanh.f32 %v334_v13 }
 0x156   :  { %v497_v14 = vpop.eup %496 }
 0x157   :  { %v499_v15 = vpop.eup %498  ;;  %v364_v16 = vmul.f32 %v497_v14, %v351_v59 }
 0x158   :  { %v501_v17 = vpop.eup %500  ;;  %v365_v18 = vmul.f32 %v499_v15, %v351_v59 }
 0x159   :  { %v503_v19 = vpop.eup %502  ;;  %368 = vst [vmem:[#allocation13] sm:$0xff] %v364_v16  ;;  %v366_v20 = vmul.f32 %v501_v17, %v363_v61 }
 0x15a   :  { %369 = vst [vmem:[#allocation13 + $0x8] sm:$0xff] %v365_v18  ;;  %v367_v21 = vmul.f32 %v503_v19, %v363_v61 }
 0x15b   :  { %370 = vst [vmem:[#allocation13 + $0x18] sm:$0xff] %v366_v20 }
 0x15c   :  { %371 = vst [vmem:[#allocation13 + $0x20] sm:$0xff] %v367_v21 }
 0x15d   :  { %603 = shalt.err (!%p600_p8)
}
 0x15e   :  { %s604_s1 = scalar_lea.hbm %s826_s6, 768 }
 0x15f   :  { %p605_p9 = scmp.ne.s32.totalorder %s826_s6, %s604_s1  ;;  %p608_p10 = scmp.lt.u32.totalorder %s604_s1, %s826_s6 }
 0x161   :  { %p610_p11 = pnand %p608_p10, %p605_p9 }
 0x163   :  { %613 = shalt.err (!%p610_p11)
}
 0x164   :  { %s632_s25 = smov 384   ;;  %s633_s8 = smov 24  }
 0x165   :  { %389 = dma.vmem_to_hbm [thread:$0]  %s384_s18, 768, %s826_s6, [#allocation9], %s632_s25, %s632_s25, %s633_s8  }
 0x166   :  { %620 = dma.done.wait [#allocation9], 768  }
 0x167   :  { %621 = vsyncadd [#allocation9], 4294966528 }
 0x168   :  { %393 = vsyncpa [#allocation8], 1 }
 0x169   :  { %394 = vsyncpa [#allocation11], 1 }
 0x16a   :  { %395 = vsyncpa [#allocation9], 1 }

</bundles_post_ra>
